<compile_context>
chip_gen: v7x
topology: tpu7x:2x2x1
jax: 0.10.0
libtpu: 0.0.40
codegen_flags: <defaults>
</compile_context>

<pallas_src>
import functools

import jax
import jax.numpy as jnp
from jax.experimental import pallas as pl
from jax.experimental.pallas import tpu as pltpu

K = 3  # conv kernel size (fixed by the module default)


def _chip_params():
    """Per-generation tiling knobs: (MXU M target, Cout tile, VMEM cap)."""
    kind = ""
    try:
        kind = jax.devices()[0].device_kind.lower()
    except Exception:
        pass
    if "v7" in kind:        # 64 MiB VMEM, 256-wide MXU, 2 TensorCores
        return 256, 128, 56 * 1024 * 1024
    if "v6" in kind:        # 128 MiB VMEM, 256-wide MXU
        return 256, 128, 96 * 1024 * 1024
    return 128, 128, 96 * 1024 * 1024   # v5e and older: 128-wide MXU


def _pick_rows(H, Wp, m_target):
    """Rows per strip: a divisor of H with rows*Wp near the MXU M target,
    but at least 8 rows when H allows, so the halo duplication factor
    (rows+2)/rows and the per-step overhead stay small for wide images."""
    best = 1
    for r in range(1, H + 1):
        if H % r == 0 and r * Wp <= m_target:
            best = r
    if best < 8:
        for r in range(8, H + 1):
            if H % r == 0:
                return r
    return best


def conv_bn_relu_kernel(x_ref, w_ref, shift_ref, o_ref, *, rows, apply_relu):
    """One grid step = (batch n, cout-tile j, row-strip s).

    x_ref     : (1, 1, rows+2, Wp, Cin)  halo strip of the H-padded NHWC image
    w_ref     : (K, K*Cin, tn)           BN-folded weights; kw merged into the
                                         contraction dim, Cout tiled by tn
    shift_ref : (1, tn)                  folded conv-bias + BN shift
    o_ref     : (1, rows, Wp, tn)        output tile (lane-dense tn)
    """
    cin = x_ref.shape[-1]
    wp = x_ref.shape[-2]
    tn = o_ref.shape[-1]

    x = x_ref[0, 0]                                          # (rows+2, Wp, Cin)
    zcol = jnp.zeros((rows + 2, 1, cin), x.dtype)
    # Three width-shifted copies concatenated along channels -> contraction
    # depth K*Cin (3 MXU pushes per strip instead of 9, each 3x deeper).
    xs = jnp.concatenate(
        [jnp.concatenate([zcol, x[:, :wp - 1, :]], axis=1),  # kw=0 : col w-1
         x,                                                  # kw=1 : col w
         jnp.concatenate([x[:, 1:, :], zcol], axis=1)],      # kw=2 : col w+1
        axis=-1)                                             # (rows+2, Wp, K*Cin)

    acc = jnp.zeros((rows * wp, tn), jnp.float32)
    for kh in range(K):                                      # 3 MXU matmuls
        patch = xs[kh:kh + rows].reshape(rows * wp, K * cin)
        acc += jnp.dot(patch, w_ref[kh], preferred_element_type=jnp.float32)

    # Epilogue: folded conv-bias / BN shift, then ReLU.
    y = acc + shift_ref[...]
    if apply_relu:
        y = jnp.maximum(y, 0.0)
    o_ref[...] = y.reshape(1, rows, wp, tn).astype(o_ref.dtype)


def conv2d_bn_relu(x_nchw, w_oihw, bias, gamma, beta, running_mean, running_var,
                   *, eps=1e-5, act=True):
    """Equivalent of Conv2D.forward for NCHW input (inference-mode BN)."""
    N, Cin, H, W = x_nchw.shape
    Cout = w_oihw.shape[0]
    dt = x_nchw.dtype
    itemsize = jnp.dtype(dt).itemsize

    m_target, tn, vmem_cap = _chip_params()
    coutp = ((Cout + tn - 1) // tn) * tn        # lane-dense, tile-even Cout
    J = coutp // tn
    Wp = ((W + 7) // 8) * 8                     # view-friendly reshapes
    rows = _pick_rows(H, Wp, m_target)
    S = H // rows

    # --- glue: layout transform, halo strips, BN/bias folding (plain JAX) ----
    x_nhwc = jnp.transpose(x_nchw, (0, 2, 3, 1))                      # NHWC
    x_pad = jnp.pad(x_nhwc, ((0, 0), (1, 1), (0, Wp - W), (0, 0)))    # H halo + W round-up
    ridx = jnp.arange(S)[:, None] * rows + jnp.arange(rows + 2)[None, :]
    strips = x_pad[:, ridx]                      # (N, S, rows+2, Wp, Cin)

    scale = gamma / jnp.sqrt(running_var + eps)
    shift = (bias - running_mean) * scale + beta                      # folded
    w_hwio = jnp.transpose(w_oihw, (2, 3, 1, 0)).astype(jnp.float32)  # (K,K,Cin,Cout)
    w_folded = (w_hwio * scale[None, None, None, :]).astype(dt)       # keep x dtype
    w_p = jnp.zeros((K, K * Cin, coutp), dt)
    w_p = w_p.at[:, :, :Cout].set(w_folded.reshape(K, K * Cin, Cout))
    shift_p = jnp.zeros((1, coutp), jnp.float32)
    shift_p = shift_p.at[:, :Cout].set(shift.astype(jnp.float32))

    kernel = functools.partial(conv_bn_relu_kernel, rows=rows, apply_relu=act)

    # --- VMEM limit / cost estimate from the actual block footprint ----------
    def _rup(v, m):
        return ((v + m - 1) // m) * m

    x_blk = (rows + 2) * _rup(Wp, 8) * _rup(Cin, 128) * itemsize
    w_blk = K * _rup(K * Cin, 8) * _rup(tn, 128) * itemsize
    o_blk = rows * _rup(Wp, 8) * _rup(tn, 128) * itemsize
    s_blk = 8 * _rup(tn, 128) * 4
    tmp_b = rows * Wp * tn * 4 + (rows + 2) * _rup(Wp, 8) * _rup(K * Cin, 128) * 4
    footprint = 2 * (x_blk + w_blk + o_blk + s_blk) + tmp_b
    vmem_limit = int(min(max(footprint + (8 << 20), 32 << 20), vmem_cap))

    flops = 2 * N * H * Wp * K * K * Cin * coutp
    bytes_accessed = (J * strips.size * itemsize
                      + N * (w_p.size * itemsize + shift_p.size * 4)
                      + N * H * Wp * coutp * itemsize)

    out_nhwc = pl.pallas_call(
        kernel,
        out_shape=jax.ShapeDtypeStruct((N, H, Wp, coutp), dt),
        grid=(N, J, S),
        in_specs=[
            pl.BlockSpec((1, 1, rows + 2, Wp, Cin),
                         lambda n, j, s: (n, s, 0, 0, 0)),
            pl.BlockSpec((K, K * Cin, tn), lambda n, j, s: (0, 0, j)),
            pl.BlockSpec((1, tn), lambda n, j, s: (0, j)),
        ],
        out_specs=pl.BlockSpec((1, rows, Wp, tn), lambda n, j, s: (n, s, 0, j)),
        compiler_params=pltpu.CompilerParams(
            # All iterations are independent; n and the Cout-tile axis j are
            # "parallel" so dual-TC chips split work even when N == 1.
            dimension_semantics=("parallel", "parallel", "arbitrary"),
            vmem_limit_bytes=vmem_limit),
        cost_estimate=pl.CostEstimate(flops=flops, transcendentals=0,
                                      bytes_accessed=bytes_accessed),
    )(strips, w_p, shift_p)

    out_nhwc = out_nhwc[:, :, :W, :Cout]                  # drop W / Cout padding
    return jnp.transpose(out_nhwc, (0, 3, 1, 2))          # back to NCHW


def _reference(x_nchw, w_oihw, bias, gamma, beta, mean, var, eps=1e-5, act=True):
    """Pure-JAX reference (lax conv + inference BN + ReLU), NCHW."""
    y = jax.lax.conv_general_dilated(
        x_nchw.astype(jnp.float32), w_oihw.astype(jnp.float32),
        window_strides=(1, 1), padding=((1, 1), (1, 1)),
        dimension_numbers=("NCHW", "OIHW", "NCHW"))
    y = y + bias[None, :, None, None]
    scale = gamma / jnp.sqrt(var + eps)
    shift = beta - mean * scale
    y = y * scale[None, :, None, None] + shift[None, :, None, None]
    if act:
        y = jnp.maximum(y, 0.0)
    return y


if __name__ == "__main__":
    # Small deterministic example consistent with the module (NCHW input).
    N, Cin, Cout, H, W = 2, 4, 8, 16, 16
    key = jax.random.PRNGKey(0)
    kx, kw, kb, kg, kbeta, km, kv = jax.random.split(key, 7)

    x = jax.random.normal(kx, (N, Cin, H, W), dtype=jnp.float32)
    # Conv2d params (OIHW) — deterministic synthetic init.
    w = jax.random.normal(kw, (Cout, Cin, K, K), dtype=jnp.float32) * 0.1
    b = jax.random.normal(kb, (Cout,), dtype=jnp.float32) * 0.1
    # BatchNorm2d params / running stats (inference mode).
    gamma = 1.0 + 0.1 * jax.random.normal(kg, (Cout,), dtype=jnp.float32)
    beta = 0.1 * jax.random.normal(kbeta, (Cout,), dtype=jnp.float32)
    running_mean = 0.1 * jax.random.normal(km, (Cout,), dtype=jnp.float32)
    running_var = 1.0 + 0.1 * jax.random.uniform(kv, (Cout,), dtype=jnp.float32)

    out = conv2d_bn_relu(x, w, b, gamma, beta, running_mean, running_var, act=True)
    out = jax.block_until_ready(out)

    ref = _reference(x, w, b, gamma, beta, running_mean, running_var, act=True)
    assert out.shape == (N, Cout, H, W), out.shape
    assert jnp.allclose(out, ref, atol=1e-4, rtol=1e-4), float(jnp.abs(out - ref).max())

    print("KERNEL_OK")
</pallas_src>

<mosaic_0001>
module attributes {stable_mosaic.version = 11 : i64} {
  func.func @conv_bn_relu_kernel(%arg0: i32, %arg1: i32, %arg2: i32, %arg3: memref<1x1x10x16x4xf32, #tpu.memory_space<vmem>>, %arg4: memref<3x12x128xf32, #tpu.memory_space<vmem>>, %arg5: memref<1x128xf32, #tpu.memory_space<vmem>>, %arg6: memref<1x8x16x128xf32, #tpu.memory_space<vmem>>) attributes {dimension_semantics = [#tpu.dimension_semantics<parallel>, #tpu.dimension_semantics<parallel>, #tpu.dimension_semantics<arbitrary>], iteration_bounds = array<i64: 2, 1, 2>, scalar_prefetch = 0 : i64, scratch_operands = 0 : i64, tpu.core_type = #tpu.core_type<tc>, window_params = [{transform_indices = @transform_0, window_bounds = array<i64: 1, 1, 10, 16, 4>}, {transform_indices = @transform_1, window_bounds = array<i64: 3, 12, 128>}, {transform_indices = @transform_2, window_bounds = array<i64: 1, 128>}, {transform_indices = @transform_3, window_bounds = array<i64: 1, 8, 16, 128>}]} {
    %c0 = arith.constant 0 : index
    %c0_0 = arith.constant 0 : index
    %c0_1 = arith.constant 0 : index
    %c0_2 = arith.constant 0 : index
    %c0_3 = arith.constant 0 : index
    %0 = vector.load %arg3[%c0, %c0_0, %c0_1, %c0_2, %c0_3] : memref<1x1x10x16x4xf32, #tpu.memory_space<vmem>>, vector<1x1x10x16x4xf32>
    %1 = vector.shape_cast %0 : vector<1x1x10x16x4xf32> to vector<10x16x4xf32>
    %cst = arith.constant 0.000000e+00 : f32
    %2 = vector.broadcast %cst : f32 to vector<10x1x4xf32>
    %3 = vector.extract_strided_slice %1 {offsets = [0, 0, 0], sizes = [10, 15, 4], strides = [1, 1, 1]} : vector<10x16x4xf32> to vector<10x15x4xf32>
    %4 = tpu.concatenate %2, %3 in 1 : vector<10x1x4xf32>, vector<10x15x4xf32> -> vector<10x16x4xf32>
    %5 = vector.extract_strided_slice %1 {offsets = [0, 1, 0], sizes = [10, 15, 4], strides = [1, 1, 1]} : vector<10x16x4xf32> to vector<10x15x4xf32>
    %6 = tpu.concatenate %5, %2 in 1 : vector<10x15x4xf32>, vector<10x1x4xf32> -> vector<10x16x4xf32>
    %7 = tpu.concatenate %4, %1, %6 in 2 : vector<10x16x4xf32>, vector<10x16x4xf32>, vector<10x16x4xf32> -> vector<10x16x12xf32>
    %cst_4 = arith.constant 0.000000e+00 : f32
    %8 = vector.broadcast %cst_4 : f32 to vector<128x128xf32>
    %9 = vector.extract_strided_slice %7 {offsets = [0, 0, 0], sizes = [8, 16, 12], strides = [1, 1, 1]} : vector<10x16x12xf32> to vector<8x16x12xf32>
    %10 = vector.shape_cast %9 : vector<8x16x12xf32> to vector<128x12xf32>
    %c0_5 = arith.constant 0 : index
    %c0_6 = arith.constant 0 : index
    %c0_7 = arith.constant 0 : index
    %11 = vector.load %arg4[%c0_5, %c0_6, %c0_7] : memref<3x12x128xf32, #tpu.memory_space<vmem>>, vector<1x12x128xf32>
    %12 = vector.shape_cast %11 : vector<1x12x128xf32> to vector<12x128xf32>
    %cst_8 = arith.constant dense<0.000000e+00> : vector<128x128xf32>
    %13 = tpu.matmul %10, %12, %cst_8 {dimension_numbers = #tpu.dot_dimension_numbers<[1], [0], [0], [1], [0, 0, 1, 1], [], []>} : vector<128x12xf32>, vector<12x128xf32>, vector<128x128xf32> -> vector<128x128xf32>
    %14 = arith.addf %8, %13 : vector<128x128xf32>
    %15 = vector.extract_strided_slice %7 {offsets = [1, 0, 0], sizes = [8, 16, 12], strides = [1, 1, 1]} : vector<10x16x12xf32> to vector<8x16x12xf32>
    %16 = vector.shape_cast %15 : vector<8x16x12xf32> to vector<128x12xf32>
    %c1 = arith.constant 1 : index
    %c0_9 = arith.constant 0 : index
    %c0_10 = arith.constant 0 : index
    %17 = vector.load %arg4[%c1, %c0_9, %c0_10] : memref<3x12x128xf32, #tpu.memory_space<vmem>>, vector<1x12x128xf32>
    %18 = vector.shape_cast %17 : vector<1x12x128xf32> to vector<12x128xf32>
    %cst_11 = arith.constant dense<0.000000e+00> : vector<128x128xf32>
    %19 = tpu.matmul %16, %18, %cst_11 {dimension_numbers = #tpu.dot_dimension_numbers<[1], [0], [0], [1], [0, 0, 1, 1], [], []>} : vector<128x12xf32>, vector<12x128xf32>, vector<128x128xf32> -> vector<128x128xf32>
    %20 = arith.addf %14, %19 : vector<128x128xf32>
    %21 = vector.extract_strided_slice %7 {offsets = [2, 0, 0], sizes = [8, 16, 12], strides = [1, 1, 1]} : vector<10x16x12xf32> to vector<8x16x12xf32>
    %22 = vector.shape_cast %21 : vector<8x16x12xf32> to vector<128x12xf32>
    %c2 = arith.constant 2 : index
    %c0_12 = arith.constant 0 : index
    %c0_13 = arith.constant 0 : index
    %23 = vector.load %arg4[%c2, %c0_12, %c0_13] : memref<3x12x128xf32, #tpu.memory_space<vmem>>, vector<1x12x128xf32>
    %24 = vector.shape_cast %23 : vector<1x12x128xf32> to vector<12x128xf32>
    %cst_14 = arith.constant dense<0.000000e+00> : vector<128x128xf32>
    %25 = tpu.matmul %22, %24, %cst_14 {dimension_numbers = #tpu.dot_dimension_numbers<[1], [0], [0], [1], [0, 0, 1, 1], [], []>} : vector<128x12xf32>, vector<12x128xf32>, vector<128x128xf32> -> vector<128x128xf32>
    %26 = arith.addf %20, %25 : vector<128x128xf32>
    %c0_15 = arith.constant 0 : index
    %c0_16 = arith.constant 0 : index
    %27 = vector.load %arg5[%c0_15, %c0_16] : memref<1x128xf32, #tpu.memory_space<vmem>>, vector<1x128xf32>
    %28 = vector.broadcast %27 : vector<1x128xf32> to vector<128x128xf32>
    %29 = arith.addf %26, %28 : vector<128x128xf32>
    %cst_17 = arith.constant 0.000000e+00 : f32
    %30 = vector.broadcast %cst_17 : f32 to vector<128x128xf32>
    %31 = arith.maximumf %29, %30 : vector<128x128xf32>
    %32 = vector.shape_cast %31 : vector<128x128xf32> to vector<1x8x16x128xf32>
    %c0_18 = arith.constant 0 : index
    %c0_19 = arith.constant 0 : index
    %c0_20 = arith.constant 0 : index
    %c0_21 = arith.constant 0 : index
    %33 = vector.load %arg6[%c0_18, %c0_19, %c0_20, %c0_21] : memref<1x8x16x128xf32, #tpu.memory_space<vmem>>, vector<1x8x16x128xf32>
    tpu.vector_store %arg6[%c0_18, %c0_19, %c0_20, %c0_21], %32 {strides = array<i32>} : memref<1x8x16x128xf32, #tpu.memory_space<vmem>>, vector<1x8x16x128xf32>,
    return
  }
  func.func @transform_0(%arg0: i32, %arg1: i32, %arg2: i32) -> (i32, i32, i32, i32, i32) {
    %c0_i32 = arith.constant 0 : i32
    %c0_i32_0 = arith.constant 0 : i32
    %c0_i32_1 = arith.constant 0 : i32
    %c0_i32_2 = arith.constant 0 : i32
    return %arg0, %arg2, %c0_i32, %c0_i32_0, %c0_i32_1 : i32, i32, i32, i32, i32
  }
  func.func @transform_1(%arg0: i32, %arg1: i32, %arg2: i32) -> (i32, i32, i32) {
    %c0_i32 = arith.constant 0 : i32
    %c0_i32_0 = arith.constant 0 : i32
    %c0_i32_1 = arith.constant 0 : i32
    return %c0_i32, %c0_i32_0, %arg1 : i32, i32, i32
  }
  func.func @transform_2(%arg0: i32, %arg1: i32, %arg2: i32) -> (i32, i32) {
    %c0_i32 = arith.constant 0 : i32
    %c0_i32_0 = arith.constant 0 : i32
    return %c0_i32, %arg1 : i32, i32
  }
  func.func @transform_3(%arg0: i32, %arg1: i32, %arg2: i32) -> (i32, i32, i32, i32) {
    %c0_i32 = arith.constant 0 : i32
    %c0_i32_0 = arith.constant 0 : i32
    return %arg0, %arg2, %c0_i32, %arg1 : i32, i32, i32, i32
  }
}

</mosaic_0001>

<bundles_post_ra>
// kernel: tpu_custom_call.1
= control target key start
LH: loop header
LB: loop body
LE: loop exit
PB: predicated region body
PF: predicated region fallthrough
CT: control target
= control target key end

     0   :  { %8 = vsyncpa [#allocation3], 0  ;;  %s2300_s0 = inlined_call_operand.vmem [shape: f32[2,2,10,16,4], index: 0, kind: input, shape index: {}]   ;;  %s2301_s1 = inlined_call_operand.vmem [shape: f32[3,12,128], index: 1, kind: input, shape index: {}]   ;;  %s2302_s2 = inlined_call_operand.vmem [shape: f32[1,128], index: 2, kind: input, shape index: {}]   ;;  %s2303_s3 = inlined_call_operand.hbm [shape: f32[2,16,16,128], index: 3, kind: output, shape index: {}]  }
   0x1   :  { %10 = vsyncpa [#allocation3 + $0x1], 0  ;;  %s1742_s12 = smov 0   ;;  %s1744_s13 = smov 0  }
   0x2   :  { %s1746_s14 = smov 0   ;;  %s1748_s15 = smov 0  }
   0x3   :  { %s1750_s16 = smov 0   ;;  %s1752_s17 = smov 0  }
   0x4   :  { %s1754_s18 = smov 0   ;;  %s1756_s19 = smov 0  }
   0x5 LB: > { %s1281_s20 = sadd.s32 4294967295, %s1715_s19   ;;  %s1282_s21 = sadd.s32 4294967294, %s1715_s19   ;;  %s1715_s19 = sphi %s1756_s19, %s16_s19   ;;  %s1711_s18 = sphi %s1754_s18, %s2314_s18   ;;  %s1707_s17 = sphi %s1752_s17, %s2313_s17   ;;  %s1703_s16 = sphi %s1750_s16, %s2312_s16   ;;  %s1699_s15 = sphi %s1748_s15, %s2311_s15   ;;  %s1695_s14 = sphi %s1746_s14, %s2310_s14   ;;  %s1691_s13 = sphi %s1744_s13, %s2309_s13   ;;  %s1687_s12 = sphi %s1742_s12, %s2308_s12  }
   0x6   : > { %s28_s22 = sadd.s32 1, %s1707_s17  ;;  %s35_s23 = sadd.s32 1, %s1711_s18 }
   0x7   : > { %p29_p0 = scmp.ge.s32.totalorder %s28_s22, 2  ;;  %p136_p1 = scmp.ne.s32.totalorder %s1695_s14, %s1691_s13 }
   0x8   : > { %p137_p2 = scmp.eq.s32.totalorder %s1281_s20, 3  ;;  %p142_p5 = scmp.ne.s32.totalorder %s1691_s13, %s1687_s12 }
   0x9   : > { %s2316_s22 = smov (%p29_p0, %s28_s22), 0  ;;  %s2318_s23 = smov (!%p29_p0, %s35_s23), %s1711_s18 }
   0xa   : > { %s120_s24 = ssub.s32 %s1707_s17, %s2316_s22  ;;  %p1793_p3 = por %p137_p2, %p136_p1 }
   0xb   : > { %p37_p4 = scmp.ge.s32.totalorder %s2318_s23, 2  ;;  %p143_p6 = scmp.eq.s32.totalorder %s1282_s21, 3 }
   0xc   : > { %p1287_p7 = scmp.ge.s32.totalorder %s1715_s19, 1  ;;  %p186_p9 = scmp.lt.s32.totalorder %s1715_s19, 5 }
   0xd   : > { %s2320_s23 = smov (%p37_p4, %s2318_s23), 0  ;;  %p1802_p8 = por %p143_p6, %p142_p5 }
   0xe   : > { %s119_s27 = ssub.s32 %s1711_s18, %s2320_s23  ;;  %s126_s28 = sadd.s32 1, %s1695_s14 }
   0xf   : > { %s121_s29 = sor.u32 %s120_s24, %s119_s27  ;;  %p187_p10 = pnand %p1287_p7, %p186_p9 }
  0x10   : > { %p124_p11 = scmp.eq.s32.totalorder %s121_s29, 0  ;;  %p221_p12 = scmp.lt.s32.totalorder (!%p187_p10), %s1703_s16, 1  ;;  %v1290_v0 = vld [vmem:[%s2301_s1 + $0x10] sm:$0xff] (!%p187_p10)  ;;  %v1291_v1 = vld [vmem:[%s2301_s1 + $0x18] sm:$0xf] (!%p187_p10)  ;;  %v562_v2 = vld [vmem:[%s2301_s1] sm:$0xff] (!%p187_p10) }
  0x11   : > { %190 = sbr.rel (%p187_p10) target bundleno = 468 (0x1d4), region = 32  ;;  %p223_p13 = scmp.lt.s32.totalorder (!%p187_p10), %s1699_s15, 1  ;;  %vm616_vm0 = vcmask (!%p187_p10), 1043456   ;;  %v1492_v3 = vpack.c.bf16 (!%p187_p10), %v1291_v1, %v1290_v0  ;;  %v563_v4 = vld [vmem:[%s2301_s1 + $0x8] sm:$0xf] (!%p187_p10)  ;;  %vm1717_vm1 = vmmov (!%p187_p10), 1  }
  0x12   : > { %s1811_s30 = scalar_select %p124_p11, %s1695_s14, %s126_s28  }
  0x13   : > { %vm1829_vm2 = vmpackc.low (!%p187_p10), %vm616_vm0, %vm1717_vm1  ;;  %v1833_v6 = vpack.c.bf16 (!%p187_p10), %v563_v4, %v562_v2  ;;  %vm339_vm3 = vcmask (!%p187_p10), 1046528   ;;  %s1719_s8 = smov (!%p187_p10), 8   ;;  %vm278_vm4 = vcmask (!%p187_p10), 1040384   ;;  %v1326_v42 = vld [vmem:[%s2301_s1 + $0x20] sm:$0xff] (!%p187_p10)  ;;  %v1327_v43 = vld [vmem:[%s2301_s1 + $0x28] sm:$0xf] (!%p187_p10) }
  0x14   : > { %1494 = vmatprep.subr.msk.bf16.mxu1 (!%p187_p10), %vm1829_vm2, %v1492_v3  ;;  %v1940_v51 = vpack.c.bf16 (!%p187_p10), %v1327_v43, %v1326_v42  ;;  %vm520_vm5 = vcmask (!%p187_p10), 31744   ;;  %vm541_vm6 = vcmask (!%p187_p10), 64512   ;;  %vm567_vm7 = vcmask (!%p187_p10), 97280   ;;  %s1720_s24 = smov (!%p187_p10), [#allocation2]  }
  0x15   : > { %1500 = vmatprep.subr.msk.bf16.mxu0 (!%p187_p10), %vm1829_vm2, %v1833_v6  ;;  %1497 = vmatpush3.bf16.msk.msra.mxu1 (!%p187_p10), %vm1829_vm2, %v1492_v3  ;;  %s1625_s27 = sshll.u32 (!%p187_p10), %s1720_s24, 4  ;;  %s1626_s27 = int_to_ptr.vmem [resolvable:$false] %s1625_s27 }
  0x16   : > { %1503 = vmatpush3.bf16.msk.msra.mxu0 (!%p187_p10), %vm1829_vm2, %v1833_v6  ;;  %1510 = vmatprep.subr.msk.bf16.mxu1 (!%p187_p10), %vm1829_vm2, %v1833_v6 }
  0x17   : > { %1506 = vmatprep.subr.msk.bf16.mxu0 (!%p187_p10), %vm1829_vm2, %v1940_v51 }
  0x18   : > { %s222_s4 = scalar_select %p221_p12, %s1703_s16, 1 }
  0x19   : > { %s224_s5 = scalar_select %p223_p13, %s1699_s15, 1 }
  0x1a   : > { %s1545_s6 = smul.u32 40, %s222_s4  ;;  %s1353_s4 = sshll.u32 %s1699_s15, 4 }
  0x1b   : > { %s1544_s21 = smul.u32 20, %s224_s5  ;;  %s1349_s5 = sshll.u32 %s1703_s16, 5 }
  0x1d   : > { %s227_s28 = sadd.s32 %s1545_s6, %s1544_s21  ;;  %s1718_s6 = smov 4  }
  0x1e   : > { %s1289_s29 = sshll.u32 %s227_s28, 3  ;;  %s218_s21 = sand.u32 1, %s1691_s13  }
  0x1f   : > { %s1845_s7 = scalar_lea.vmem %s2300_s0, %s1289_s29  ;;  %s1288_s28 = sshll.u32 %s218_s21, 7 }
  0x20   : > { %v239_v7 = vld [vmem:[%s1845_s7 + $0x8] sm:$0xff]  ;;  %v1855_v8 = vld [vmem:[%s1845_s7] sm:$0xff]  ;;  %v241_v9 = vld [vmem:[%s1845_s7 + $0x18] sm:$0xff]  ;;  %s2203_s29 = scalar_lea.vmem [#allocation2], %s1288_s28  ;;  %s2247_s11 = scalar_lea.sflag [#allocation3], %s218_s21 }
  0x21   : > { %392 = vrot.lane.b32.xlu1 %v239_v7, %s1718_s6  ;;  %390 = vrot.lane.b32.xlu0 %v1855_v8, %s1718_s6  ;;  %v1862_v10 = vld [vmem:[%s1845_s7 + $0x10] sm:$0xff]  ;;  %v341_v11 = vrot.slane %v239_v7, 1  ;;  %v340_v12 = vrot.slane %v1855_v8, 1  ;;  %v344_v13 = vrot.slane %v241_v9, 1  ;;  %v243_v19 = vld [vmem:[%s1845_s7 + $0x28] sm:$0xff]  ;;  %v280_v21 = vrot.slane %v239_v7, 7 }
  0x22   : > { %v343_v14 = vrot.slane %v1862_v10, 1  ;;  %v1877_v20 = vld [vmem:[%s1845_s7 + $0x20] sm:$0xff]  ;;  %v279_v22 = vrot.slane %v1855_v8, 7  ;;  %v1881_v23 = vld [vmem:[%s1845_s7 + $0x90] sm:$0xff]  ;;  %v1884_v24 = vld [vmem:[%s1845_s7 + $0x98] sm:$0xff]  ;;  %v283_v25 = vrot.slane %v241_v9, 7 }
  0x23   : > { %v342_v16 = vsel %vm339_vm3, %v340_v12, %v341_v11  ;;  %v381_v17 = vsel %vm339_vm3, %v344_v13, 0.0  ;;  %v380_v18 = vsel %vm339_vm3, %v341_v11, 0.0  ;;  %v282_v26 = vrot.slane %v1862_v10, 7  ;;  %v245_v29 = vld [vmem:[%s1845_s7 + $0x38] sm:$0xff]  ;;  %v1890_v30 = vld [vmem:[%s1845_s7 + $0x30] sm:$0xff]  ;;  %v247_v35 = vld [vmem:[%s1845_s7 + $0x48] sm:$0xff] }
  0x24   : > { %v345_v15 = vsel %vm339_vm3, %v343_v14, %v344_v13  ;;  %v286_v27 = vrot.slane %v243_v19, 7  ;;  %v285_v28 = vrot.slane %v1877_v20, 7  ;;  %v346_v31 = vrot.slane %v1877_v20, 1  ;;  %v1898_v36 = vld [vmem:[%s1845_s7 + $0x40] sm:$0xff]  ;;  %v249_v53 = vld [vmem:[%s1845_s7 + $0x58] sm:$0xff]  ;;  %v1954_v54 = vld [vmem:[%s1845_s7 + $0x50] sm:$0xff] }
  0x25   : > { %396 = vrot.lane.b32.xlu1 %v241_v9, %s1718_s6  ;;  %394 = vrot.lane.b32.xlu0 %v1862_v10, %s1718_s6  ;;  %v347_v32 = vrot.slane %v243_v19, 1  ;;  %v289_v33 = vrot.slane %v245_v29, 7  ;;  %v288_v34 = vrot.slane %v1890_v30, 7  ;;  %v292_v37 = vrot.slane %v247_v35, 7  ;;  %v251_v62 = vld [vmem:[%s1845_s7 + $0x68] sm:$0xff]  ;;  %v1972_v63 = vld [vmem:[%s1845_s7 + $0x60] sm:$0xff] }
  0x26   : > { %v291_v38 = vrot.slane %v1898_v36, 7  ;;  %v367_v39 = vrot.slane %v1881_v23, 1  ;;  %v368_v40 = vrot.slane %v1884_v24, 1  ;;  %v1906_v41 = vsel %vm278_vm4, %v279_v22, %v280_v21  ;;  %v253_v11 = vld [vmem:[%s1845_s7 + $0x78] sm:$0xff]  ;;  %v1990_v12 = vld [vmem:[%s1845_s7 + $0x70] sm:$0xff]  ;;  %v255_v21 = vld [vmem:[%s1845_s7 + $0x88] sm:$0xff] }
  0x27   : > { %v1923_v46 = vsel %vm278_vm4, %v282_v26, %v283_v25  ;;  %v1931_v47 = vsel %vm278_vm4, %v285_v28, %v286_v27  ;;  %v1936_v48 = vsel %vm278_vm4, %v288_v34, %v289_v33  ;;  %v382_v49 = vsel %vm339_vm3, %v347_v32, 0.0  ;;  %v2008_v25 = vld [vmem:[%s1845_s7 + $0x80] sm:$0xff]  ;;  %s1162_s7 = sadd.s32 %s1353_s4, %s1349_s5  ;;  %s1165_s16 = sshll.u32 %s2203_s29, 4  ;;  %s2241_s16 = int_to_ptr.vmem [resolvable:$true] %s1165_s16 }
  0x28   : > { %v1915_v44 = vsel %vm339_vm3, %v367_v39, %v368_v40  ;;  %v1918_v45 = vsel %vm339_vm3, %v368_v40, 0.0  ;;  %v348_v50 = vsel %vm339_vm3, %v346_v31, %v347_v32  ;;  %v1945_v52 = vsel %vm278_vm4, %v291_v38, %v292_v37  ;;  %s1350_s15 = sshll.u32 %s1162_s7, 7  ;;  %s1621_s20 = scalar_lea.vmem %s2241_s16, 2048 }
  0x29   : > { %464 = vrot.lane.b32.xlu1 %v345_v15, %s1719_s8  ;;  %460 = vrot.lane.b32.xlu0 %v342_v16, %s1719_s8  ;;  %v349_v55 = vrot.slane %v1890_v30, 1  ;;  %v350_v56 = vrot.slane %v245_v29, 1  ;;  %v295_v57 = vrot.slane %v249_v53, 7  ;;  %v294_v58 = vrot.slane %v1954_v54, 7  ;;  %s2239_s10 = scalar_lea.hbm %s2303_s3, %s1350_s15  ;;  %p1622_p0 = scmp.ne.s32.totalorder %s2241_s16, %s1621_s20 }
  0x2a   : > { %v352_v0 = vrot.slane %v1898_v36, 1  ;;  %v353_v1 = vrot.slane %v247_v35, 1  ;;  %v298_v2 = vrot.slane %v251_v62, 7  ;;  %v297_v3 = vrot.slane %v1972_v63, 7  ;;  %s1627_s28 = scalar_lea.vmem %s1626_s27, 4096  ;;  %p1628_p4 = scmp.lt.s32.totalorder %s2241_s16, %s1626_s27 }
  0x2b   : > { %v383_v59 = vsel %vm339_vm3, %v350_v56, 0.0  ;;  %v351_v60 = vsel %vm339_vm3, %v349_v55, %v350_v56  ;;  %v1966_v61 = vsel %vm278_vm4, %v294_v58, %v295_v57  ;;  %v355_v13 = vrot.slane %v1954_v54, 1  ;;  %p1623_p1 = pnand %p1622_p0, %p1793_p3  ;;  %p1629_p5 = scmp.lt.s32.totalorder %s1627_s28, %s1621_s20 }
  0x2c   : > { %v384_v4 = vsel %vm339_vm3, %v353_v1, 0.0  ;;  %v354_v7 = vsel %vm339_vm3, %v352_v0, %v353_v1  ;;  %v1984_v9 = vsel %vm278_vm4, %v297_v3, %v298_v2  ;;  %v356_v14 = vrot.slane %v249_v53, 1 }
  0x2d   : > { %466 = vrot.lane.b32.xlu1 %v381_v17, %s1719_s8  ;;  %462 = vrot.lane.b32.xlu0 %v380_v18, %s1719_s8  ;;  %v301_v15 = vrot.slane %v253_v11, 7  ;;  %v300_v16 = vrot.slane %v1990_v12, 7  ;;  %v358_v27 = vrot.slane %v1972_v63, 1  ;;  %v304_v31 = vrot.slane %v255_v21, 7  ;;  %p1624_p2 = pneg %p1623_p1  ;;  %p1630_p6 = por %p1629_p5, %p1628_p4 }
  0x2e   : > { %v385_v17 = vsel %vm339_vm3, %v356_v14, 0.0  ;;  %v357_v18 = vsel %vm339_vm3, %v355_v13, %v356_v14  ;;  %v303_v32 = vrot.slane %v2008_v25, 7  ;;  %v361_v39 = vrot.slane %v1990_v12, 1 }
  0x2f   : > { %v362_v40 = vrot.slane %v253_v11, 1  ;;  %v365_v55 = vrot.slane %v255_v21, 1  ;;  %p1631_p7 = pnand %p1630_p6, %p1624_p2 }
  0x30   : > { %v2020_v37 = vsel %vm278_vm4, %v303_v32, %v304_v31 }
  0x31   : > { %400 = vrot.lane.b32.xlu1 %v243_v19, %s1718_s6  ;;  %398 = vrot.lane.b32.xlu0 %v1877_v20, %s1718_s6  ;;  %v2002_v19 = vsel %vm278_vm4, %v300_v16, %v301_v15  ;;  %v387_v42 = vsel %vm339_vm3, %v362_v40, 0.0  ;;  %v363_v43 = vsel %vm339_vm3, %v361_v39, %v362_v40  ;;  %v332_v20 = vsel %vm278_vm4, 0.0, %v288_v34 }
  0x35   : > { %470 = vrot.lane.b32.xlu1 %v382_v49, %s1719_s8  ;;  %468 = vrot.lane.b32.xlu0 %v348_v50, %s1719_s8  ;;  %v306_v49 = vrot.slane %v1881_v23, 7  ;;  %v307_v50 = vrot.slane %v1884_v24, 7 }
  0x37   : > { %v2036_v56 = vsel %vm278_vm4, 0.0, %v306_v49  ;;  %v2039_v57 = vsel %vm278_vm4, %v306_v49, %v307_v50 }
  0x39   : > { %404 = vrot.lane.b32.xlu1 %v245_v29, %s1718_s6  ;;  %402 = vrot.lane.b32.xlu0 %v1890_v30, %s1718_s6  ;;  %v359_v29 = vrot.slane %v251_v62, 1 }
  0x3b   : > { %v386_v33 = vsel %vm339_vm3, %v359_v29, 0.0 }
  0x3d   : > { %474 = vrot.lane.b32.xlu1 %v383_v59, %s1719_s8  ;;  %472 = vrot.lane.b32.xlu0 %v351_v60, %s1719_s8  ;;  %v388_v59 = vsel %vm339_vm3, %v365_v55, 0.0 }
  0x41   : > { %408 = vrot.lane.b32.xlu1 %v247_v35, %s1718_s6  ;;  %406 = vrot.lane.b32.xlu0 %v1898_v36, %s1718_s6  ;;  %v360_v35 = vsel %vm339_vm3, %v358_v27, %v359_v29 }
  0x45   : > { %478 = vrot.lane.b32.xlu1 %v384_v4, %s1719_s8  ;;  %476 = vrot.lane.b32.xlu0 %v354_v7, %s1719_s8  ;;  %v329_v4 = vsel %vm278_vm4, 0.0, %v279_v22 }
  0x49   : > { %412 = vrot.lane.b32.xlu1 %v249_v53, %s1718_s6  ;;  %410 = vrot.lane.b32.xlu0 %v1954_v54, %s1718_s6  ;;  %v364_v53 = vrot.slane %v2008_v25, 1 }
  0x4b   : > { %v366_v60 = vsel %vm339_vm3, %v364_v53, %v365_v55 }
  0x4d   : > { %482 = vrot.lane.b32.xlu1 %v385_v17, %s1719_s8  ;;  %480 = vrot.lane.b32.xlu0 %v357_v18, %s1719_s8 }
  0x51   : > { %416 = vrot.lane.b32.xlu1 %v251_v62, %s1718_s6  ;;  %414 = vrot.lane.b32.xlu0 %v1972_v63, %s1718_s6 }
  0x55   : > { %486 = vrot.lane.b32.xlu1 %v386_v33, %s1719_s8  ;;  %484 = vrot.lane.b32.xlu0 %v360_v35, %s1719_s8 }
  0x59   : > { %420 = vrot.lane.b32.xlu1 %v253_v11, %s1718_s6  ;;  %418 = vrot.lane.b32.xlu0 %v1990_v12, %s1718_s6 }
  0x5d   : > { %490 = vrot.lane.b32.xlu1 %v387_v42, %s1719_s8  ;;  %488 = vrot.lane.b32.xlu0 %v363_v43, %s1719_s8 }
  0x61   : > { %424 = vrot.lane.b32.xlu1 %v255_v21, %s1718_s6  ;;  %422 = vrot.lane.b32.xlu0 %v2008_v25, %s1718_s6 }
  0x65   : > { %494 = vrot.lane.b32.xlu1 %v388_v59, %s1719_s8  ;;  %492 = vrot.lane.b32.xlu0 %v366_v60, %s1719_s8 }
  0x69   : > { %426 = vrot.lane.b32.xlu0 %v1881_v23, %s1718_s6  ;;  %428 = vrot.lane.b32.xlu1 %v1884_v24, %s1718_s6  ;;  %v330_v23 = vsel %vm278_vm4, 0.0, %v282_v26 }
  0x6d   : > { %496 = vrot.lane.b32.xlu0 %v1915_v44, %s1719_s8  ;;  %498 = vrot.lane.b32.xlu1 %v1918_v45, %s1719_s8 }
  0x93   : > { %v393_v62 = vpop.permute.xlu1 %392  ;;  %v391_v0 = vpop.permute.xlu0 %390 }
  0x94   : > { %v521_v24 = vsel %vm520_vm5, %v329_v4, %v391_v0  ;;  %v522_v8 = vsel %vm520_vm5, %v1906_v41, %v393_v62 }
  0x97   : > { %v397_v1 = vpop.permute.xlu1 %396  ;;  %v395_v2 = vpop.permute.xlu0 %394 }
  0x98   : > { %v523_v44 = vsel %vm520_vm5, %v330_v23, %v395_v2  ;;  %v524_v10 = vsel %vm520_vm5, %v1923_v46, %v397_v1  ;;  %v331_v46 = vsel %vm278_vm4, 0.0, %v285_v28 }
  0x9b   : > { %v465_v45 = vpop.permute.xlu1 %464  ;;  %v461_v7 = vpop.permute.xlu0 %460 }
  0x9c   : > { %v544_v11 = vsel %vm541_vm6, %v523_v44, %v465_v45  ;;  %v542_v13 = vsel %vm541_vm6, %v521_v24, %v461_v7 }
  0x9d   : > { %1412 = vmatprep.mubr.msk.f32.mxu1 %vm567_vm7, %v544_v11  ;;  %1440 = vmatprep.mubr.msk.f32.mxu0 %vm567_vm7, %v542_v13 }
  0x9f   : > { %v467_v22 = vpop.permute.xlu1 %466  ;;  %v463_v26 = vpop.permute.xlu0 %462 }
  0xa0   : > { %v545_v14 = vsel %vm541_vm6, %v524_v10, %v467_v22  ;;  %v543_v15 = vsel %vm541_vm6, %v522_v8, %v463_v26 }
  0xa1   : > { %1413 = vmatmul.mubr.msk.f32.vlgmr.msra.gmra.mrb[0].mxu1 %vm567_vm7, %v545_v14  ;;  %1441 = vmatmul.mubr.msk.f32.vlgmr.msra.gmra.mrb[0].mxu0 %vm567_vm7, %v543_v15 }
  0xa2   : > { %1443 = vmatprep.mubr.msk.f32.mxu0 %vm567_vm7, %v544_v11  ;;  %1509 = vmatpush3.bf16.msk.msra.mxu0 %vm1829_vm2, %v1940_v51 }
  0xa3   : > { %v401_v41 = vpop.permute.xlu1 %400  ;;  %v399_v17 = vpop.permute.xlu0 %398  ;;  %1511 = vmatpush3.bf16.msk.msra.mxu1 %vm1829_vm2, %v1833_v6 }
  0xa4   : > { %v526_v18 = vsel %vm520_vm5, %v1931_v47, %v401_v41  ;;  %v525_v21 = vsel %vm520_vm5, %v331_v46, %v399_v17 }
  0xa5   : > { %1444 = vmatmul.mubr.msk.f32.gmra.mrb[2].mxu0 %vm567_vm7, %v545_v14 }
  0xa7   : > { %v471_v27 = vpop.permute.xlu1 %470  ;;  %v469_v29 = vpop.permute.xlu0 %468 }
  0xa8   : > { %v547_v51 = vsel %vm541_vm6, %v526_v18, %v471_v27  ;;  %v546_v31 = vsel %vm541_vm6, %v525_v21, %v469_v29 }
  0xa9   : > { %1415 = vmatprep.mubr.msk.f32.mxu1 %vm567_vm7, %v546_v31  ;;  %1446 = vmatprep.mubr.msk.f32.mxu0 %vm567_vm7, %v546_v31 }
  0xaa   : > { %1416 = vmatmul.mubr.msk.f32.gmra.mrb[2].mxu1 %vm567_vm7, %v547_v51  ;;  %1447 = vmatmul.mubr.msk.f32.gmra.mrb[4].mxu0 %vm567_vm7, %v547_v51 }
  0xab   : > { %v405_v5 = vpop.permute.xlu1 %404  ;;  %v403_v6 = vpop.permute.xlu0 %402 }
  0xac   : > { %v528_v28 = vsel %vm520_vm5, %v1936_v48, %v405_v5  ;;  %v527_v47 = vsel %vm520_vm5, %v332_v20, %v403_v6  ;;  %v333_v48 = vsel %vm278_vm4, 0.0, %v291_v38 }
  0xaf   : > { %v475_v33 = vpop.permute.xlu1 %474  ;;  %v473_v35 = vpop.permute.xlu0 %472 }
  0xb0   : > { %v549_v39 = vsel %vm541_vm6, %v528_v28, %v475_v33  ;;  %v548_v40 = vsel %vm541_vm6, %v527_v47, %v473_v35  ;;  %v2197_v33 = vld [vmem:[%s2302_s2] ss:$0 sm:$0xff] }
  0xb1   : > { %1418 = vmatprep.mubr.msk.f32.mxu1 %vm567_vm7, %v548_v40  ;;  %1449 = vmatprep.mubr.msk.f32.mxu0 %vm567_vm7, %v548_v40 }
  0xb2   : > { %1419 = vmatmul.mubr.msk.f32.gmra.mrb[4].mxu1 %vm567_vm7, %v549_v39  ;;  %1450 = vmatmul.mubr.msk.f32.gmra.mrb[6].mxu0 %vm567_vm7, %v549_v39 }
  0xb3   : > { %v409_v30 = vpop.permute.xlu1 %408  ;;  %v407_v34 = vpop.permute.xlu0 %406  ;;  %1468 = vmatprep.mubr.msk.f32.mxu0 %vm567_vm7, %v546_v31 }
  0xb4   : > { %v530_v42 = vsel %vm520_vm5, %v1945_v52, %v409_v30  ;;  %v529_v43 = vsel %vm520_vm5, %v333_v48, %v407_v34  ;;  %v334_v52 = vsel %vm278_vm4, 0.0, %v294_v58 }
  0xb6   : > { %1469 = vmatmul.mubr.msk.f32.vlgmr.msra.gmra.mrb[0].mxu0 %vm567_vm7, %v547_v51 }
  0xb7   : > { %v479_v49 = vpop.permute.xlu1 %478  ;;  %v477_v50 = vpop.permute.xlu0 %476  ;;  %1471 = vmatprep.mubr.msk.f32.mxu0 %vm567_vm7, %v548_v40 }
  0xb8   : > { %v2118_v53 = vsel %vm541_vm6, %v530_v42, %v479_v49  ;;  %v550_v55 = vsel %vm541_vm6, %v529_v43, %v477_v50 }
  0xb9   : > { %1421 = vmatprep.mubr.msk.f32.mxu1 %vm567_vm7, %v550_v55 }
  0xba   : > { %1422 = vmatmul.mubr.msk.f32.gmra.mrb[6].mxu1 %vm567_vm7, %v2118_v53  ;;  %1472 = vmatmul.mubr.msk.f32.gmra.mrb[2].mxu0 %vm567_vm7, %v549_v39 }
  0xbb   : > { %v413_v36 = vpop.permute.xlu1 %412  ;;  %v411_v38 = vpop.permute.xlu0 %410  ;;  %1474 = vmatprep.mubr.msk.f32.mxu0 %vm567_vm7, %v550_v55 }
  0xbc   : > { %v532_v59 = vsel %vm520_vm5, %v1966_v61, %v413_v36  ;;  %v531_v60 = vsel %vm520_vm5, %v334_v52, %v411_v38  ;;  %v335_v61 = vsel %vm278_vm4, 0.0, %v297_v3 }
  0xbe   : > { %1475 = vmatmul.mubr.msk.f32.gmra.mrb[4].mxu0 %vm567_vm7, %v2118_v53 }
  0xbf   : > { %v483_v62 = vpop.permute.xlu1 %482  ;;  %v481_v0 = vpop.permute.xlu0 %480 }
  0xc0   : > { %v553_v1 = vsel %vm541_vm6, %v532_v59, %v483_v62  ;;  %v552_v2 = vsel %vm541_vm6, %v531_v60, %v481_v0 }
  0xc1   : > { %1424 = vmatprep.mubr.msk.f32.mxu1 %vm567_vm7, %v552_v2  ;;  %1477 = vmatprep.mubr.msk.f32.mxu0 %vm567_vm7, %v552_v2 }
  0xc2   : > { %1425 = vmatmul.mubr.msk.f32.gmra.mrb[8].mxu1 %vm567_vm7, %v553_v1  ;;  %1478 = vmatmul.mubr.msk.f32.gmra.mrb[6].mxu0 %vm567_vm7, %v553_v1 }
  0xc3   : > { %v417_v54 = vpop.permute.xlu1 %416  ;;  %v415_v58 = vpop.permute.xlu0 %414 }
  0xc4   : > { %v534_v4 = vsel %vm520_vm5, %v1984_v9, %v417_v54  ;;  %v533_v23 = vsel %vm520_vm5, %v335_v61, %v415_v58  ;;  %v336_v9 = vsel %vm278_vm4, 0.0, %v300_v16 }
  0xc7   : > { %v487_v24 = vpop.permute.xlu1 %486  ;;  %v485_v44 = vpop.permute.xlu0 %484 }
  0xc8   : > { %v555_v45 = vsel %vm541_vm6, %v534_v4, %v487_v24  ;;  %v554_v7 = vsel %vm541_vm6, %v533_v23, %v485_v44 }
  0xc9   : > { %1427 = vmatprep.mubr.msk.f32.mxu1 %vm567_vm7, %v554_v7  ;;  %1480 = vmatprep.mubr.msk.f32.mxu0 %vm567_vm7, %v554_v7 }
  0xca   : > { %1428 = vmatmul.mubr.msk.f32.gmra.mrb[10].mxu1 %vm567_vm7, %v555_v45  ;;  %1481 = vmatmul.mubr.msk.f32.gmra.mrb[8].mxu0 %vm567_vm7, %v555_v45 }
  0xcb   : > { %v421_v63 = vpop.permute.xlu1 %420  ;;  %v419_v3 = vpop.permute.xlu0 %418 }
  0xcc   : > { %v536_v11 = vsel %vm520_vm5, %v2002_v19, %v421_v63  ;;  %v535_v13 = vsel %vm520_vm5, %v336_v9, %v419_v3  ;;  %v337_v19 = vsel %vm278_vm4, 0.0, %v303_v32 }
  0xcf   : > { %v491_v8 = vpop.permute.xlu1 %490  ;;  %v489_v10 = vpop.permute.xlu0 %488 }
  0xd0   : > { %v557_v22 = vsel %vm541_vm6, %v536_v11, %v491_v8  ;;  %v556_v26 = vsel %vm541_vm6, %v535_v13, %v489_v10 }
  0xd1   : > { %1430 = vmatprep.mubr.msk.f32.mxu1 %vm567_vm7, %v556_v26  ;;  %1483 = vmatprep.mubr.msk.f32.mxu0 %vm567_vm7, %v556_v26 }
  0xd2   : > { %1431 = vmatmul.mubr.msk.f32.gmra.mrb[12].mxu1 %vm567_vm7, %v557_v22  ;;  %1484 = vmatmul.mubr.msk.f32.gmra.mrb[10].mxu0 %vm567_vm7, %v557_v22 }
  0xd3   : > { %v425_v12 = vpop.permute.xlu1 %424  ;;  %v423_v16 = vpop.permute.xlu0 %422 }
  0xd4   : > { %v538_v14 = vsel %vm520_vm5, %v2020_v37, %v425_v12  ;;  %v537_v15 = vsel %vm520_vm5, %v337_v19, %v423_v16 }
  0xd7   : > { %v495_v41 = vpop.permute.xlu1 %494  ;;  %v493_v17 = vpop.permute.xlu0 %492 }
  0xd8   : > { %v559_v46 = vsel %vm541_vm6, %v538_v14, %v495_v41  ;;  %v558_v18 = vsel %vm541_vm6, %v537_v15, %v493_v17 }
  0xd9   : > { %1433 = vmatprep.mubr.msk.f32.mxu1 %vm567_vm7, %v558_v18  ;;  %1486 = vmatprep.mubr.msk.f32.mxu0 %vm567_vm7, %v558_v18 }
  0xda   : > { %1434 = vmatmul.mubr.msk.f32.gmra.mrb[14].mxu1 %vm567_vm7, %v559_v46  ;;  %1487 = vmatmul.mubr.msk.f32.gmra.mrb[12].mxu0 %vm567_vm7, %v559_v46 }
  0xdb   : > { %1452 = vmatprep.mubr.msk.f32.mxu1 %vm567_vm7, %v550_v55  ;;  %v427_v25 = vpop.permute.xlu0 %426  ;;  %v429_v32 = vpop.permute.xlu1 %428 }
  0xdc   : > { %v539_v37 = vsel %vm520_vm5, %v2036_v56, %v427_v25  ;;  %v540_v21 = vsel %vm520_vm5, %v2039_v57, %v429_v32 }
  0xde   : > { %1453 = vmatmul.mubr.msk.f32.vlgmr.msra.gmra.mrb[8].mxu1 %vm567_vm7, %v2118_v53 }
  0xdf   : > { %1455 = vmatprep.mubr.msk.f32.mxu1 %vm567_vm7, %v552_v2  ;;  %v497_v27 = vpop.permute.xlu0 %496  ;;  %v499_v29 = vpop.permute.xlu1 %498 }
  0xe0   : > { %v560_v51 = vsel %vm541_vm6, %v539_v37, %v497_v27  ;;  %v561_v31 = vsel %vm541_vm6, %v540_v21, %v499_v29 }
  0xe1   : > { %1489 = vmatprep.mubr.msk.f32.mxu0 %vm567_vm7, %v560_v51 }
  0xe2   : > { %1456 = vmatmul.mubr.msk.f32.gmra.mrb[10].mxu1 %vm567_vm7, %v553_v1  ;;  %1490 = vmatmul.mubr.msk.f32.gmra.mrb[14].mxu0 %vm567_vm7, %v561_v31 }
  0xe3   : > { %1458 = vmatprep.mubr.msk.f32.mxu1 %vm567_vm7, %v554_v7 }
  0xe6   : > { %1459 = vmatmul.mubr.msk.f32.gmra.mrb[12].mxu1 %vm567_vm7, %v555_v45 }
  0xe7   : > { %1461 = vmatprep.mubr.msk.f32.mxu1 %vm567_vm7, %v556_v26 }
  0xea   : > { %1462 = vmatmul.mubr.msk.f32.gmra.mrb[14].mxu1 %vm567_vm7, %v557_v22 }
 0x174   : > { %v1414_v56 = vpop.f32.mrb[0].mxu1 }
 0x175   : > { %v686_v57 = vpop.f32.mrb[1].mxu1 }
 0x17d   : > { %v1417_v5 = vpop.f32.mrb[2].mxu1 }
 0x17e   : > { %v696_v6 = vpop.f32.mrb[3].mxu1 }
 0x185   : > { %v1420_v20 = vpop.f32.mrb[4].mxu1 }
 0x186   : > { %v706_v28 = vpop.f32.mrb[5].mxu1 }
 0x189   : > { %v1470_v47 = vpop.f32.mrb[0].mxu0 }
 0x18a   : > { %v1512_v35 = vadd.f32 %v1470_v47, %v1414_v56  ;;  %v997_v39 = vpop.f32.mrb[1].mxu0 }
 0x18b   : > { %v1513_v40 = vadd.f32 %v997_v39, %v686_v57 }
 0x18c   : > { %v1100_v30 = vadd.f32 %v1512_v35, %v2197_v33 }
 0x18d   : > { %v1099_v34 = vadd.f32 %v1513_v40, %v2197_v33  ;;  %v1423_v48 = vpop.f32.mrb[6].mxu1  ;;  %v1473_v42 = vpop.f32.mrb[2].mxu0 }
 0x18e   : > { %v1116_v43 = vmax.f32 %v1100_v30, 0.0  ;;  %v1514_v49 = vadd.f32 %v1473_v42, %v1417_v5  ;;  %v716_v50 = vpop.f32.mrb[7].mxu1  ;;  %v1007_v53 = vpop.f32.mrb[3].mxu0 }
 0x18f   : > { %v1115_v55 = vmax.f32 %v1099_v34, 0.0  ;;  %v1515_v36 = vadd.f32 %v1007_v53, %v696_v6 }
 0x190   : > { %1132 = vst [vmem:[%s2203_s29 + $0x8] sm:$0xff] %v1116_v43  ;;  %v1102_v38 = vadd.f32 %v1514_v49, %v2197_v33 }
 0x191   : > { %1131 = vst [vmem:[%s2203_s29] sm:$0xff] %v1115_v55  ;;  %v1101_v52 = vadd.f32 %v1515_v36, %v2197_v33  ;;  %v1476_v59 = vpop.f32.mrb[4].mxu0 }
 0x192   : > { %v1118_v60 = vmax.f32 %v1102_v38, 0.0  ;;  %v1516_v62 = vadd.f32 %v1476_v59, %v1420_v20  ;;  %v1017_v0 = vpop.f32.mrb[5].mxu0 }
 0x193   : > { %v1117_v1 = vmax.f32 %v1101_v52, 0.0  ;;  %v1517_v2 = vadd.f32 %v1017_v0, %v706_v28 }
 0x194   : > { %1134 = vst [vmem:[%s2203_s29 + $0x18] sm:$0xff] %v1118_v60  ;;  %v1104_v54 = vadd.f32 %v1516_v62, %v2197_v33 }
 0x195   : > { %1133 = vst [vmem:[%s2203_s29 + $0x10] sm:$0xff] %v1117_v1  ;;  %v1103_v58 = vadd.f32 %v1517_v2, %v2197_v33  ;;  %v1479_v61 = vpop.f32.mrb[6].mxu0 }
 0x196   : > { %v1120_v4 = vmax.f32 %v1104_v54, 0.0  ;;  %v1518_v23 = vadd.f32 %v1479_v61, %v1423_v48  ;;  %v1027_v24 = vpop.f32.mrb[7].mxu0 }
 0x197   : > { %v1119_v44 = vmax.f32 %v1103_v58, 0.0  ;;  %v1519_v45 = vadd.f32 %v1027_v24, %v716_v50 }
 0x198   : > { %1136 = vst [vmem:[%s2203_s29 + $0x28] sm:$0xff] %v1120_v4  ;;  %v1106_v7 = vadd.f32 %v1518_v23, %v2197_v33 }
 0x199   : > { %1135 = vst [vmem:[%s2203_s29 + $0x20] sm:$0xff] %v1119_v44  ;;  %v1105_v63 = vadd.f32 %v1519_v45, %v2197_v33 }
 0x19a   : > { %v1122_v3 = vmax.f32 %v1106_v7, 0.0 }
 0x19b   : > { %v1121_v9 = vmax.f32 %v1105_v63, 0.0 }
 0x19c   : > { %1138 = vst [vmem:[%s2203_s29 + $0x38] sm:$0xff] %v1122_v3 }
 0x19d   : > { %1137 = vst [vmem:[%s2203_s29 + $0x30] sm:$0xff] %v1121_v9  ;;  %v1482_v11 = vpop.f32.mrb[8].mxu0 }
 0x19e   : > { %v1037_v13 = vpop.f32.mrb[9].mxu0 }
 0x1a5   : > { %v1485_v8 = vpop.f32.mrb[10].mxu0 }
 0x1a6   : > { %v1047_v10 = vpop.f32.mrb[11].mxu0 }
 0x1ad   : > { %v1488_v22 = vpop.f32.mrb[12].mxu0 }
 0x1ae   : > { %v1057_v26 = vpop.f32.mrb[13].mxu0 }
 0x1b1   : > { %v1454_v12 = vpop.f32.mrb[8].mxu1 }
 0x1b2   : > { %v1520_v16 = vadd.f32 %v1482_v11, %v1454_v12  ;;  %v880_v19 = vpop.f32.mrb[9].mxu1 }
 0x1b3   : > { %v1521_v14 = vadd.f32 %v1037_v13, %v880_v19 }
 0x1b4   : > { %v1108_v15 = vadd.f32 %v1520_v16, %v2197_v33 }
 0x1b5   : > { %v1107_v41 = vadd.f32 %v1521_v14, %v2197_v33  ;;  %v1457_v17 = vpop.f32.mrb[10].mxu1  ;;  %v1491_v46 = vpop.f32.mrb[14].mxu0 }
 0x1b6   : > { %v1124_v18 = vmax.f32 %v1108_v15, 0.0  ;;  %v1522_v25 = vadd.f32 %v1485_v8, %v1457_v17  ;;  %v890_v32 = vpop.f32.mrb[11].mxu1  ;;  %v1067_v37 = vpop.f32.mrb[15].mxu0 }
 0x1b7   : > { %v1123_v21 = vmax.f32 %v1107_v41, 0.0  ;;  %v1523_v27 = vadd.f32 %v1047_v10, %v890_v32 }
 0x1b8   : > { %1140 = vst [vmem:[%s2203_s29 + $0x48] sm:$0xff] %v1124_v18  ;;  %v1110_v29 = vadd.f32 %v1522_v25, %v2197_v33 }
 0x1b9   : > { %1139 = vst [vmem:[%s2203_s29 + $0x40] sm:$0xff] %v1123_v21  ;;  %v1109_v51 = vadd.f32 %v1523_v27, %v2197_v33  ;;  %v1460_v31 = vpop.f32.mrb[12].mxu1 }
 0x1ba   : > { %v1126_v56 = vmax.f32 %v1110_v29, 0.0  ;;  %v1524_v57 = vadd.f32 %v1488_v22, %v1460_v31  ;;  %v900_v5 = vpop.f32.mrb[13].mxu1 }
 0x1bb   : > { %v1125_v6 = vmax.f32 %v1109_v51, 0.0  ;;  %v1525_v20 = vadd.f32 %v1057_v26, %v900_v5 }
 0x1bc   : > { %1142 = vst [vmem:[%s2203_s29 + $0x58] sm:$0xff] %v1126_v56  ;;  %v1112_v28 = vadd.f32 %v1524_v57, %v2197_v33 }
 0x1bd   : > { %1141 = vst [vmem:[%s2203_s29 + $0x50] sm:$0xff] %v1125_v6  ;;  %v1111_v47 = vadd.f32 %v1525_v20, %v2197_v33  ;;  %v1463_v35 = vpop.f32.mrb[14].mxu1 }
 0x1be   : > { %v1128_v39 = vmax.f32 %v1112_v28, 0.0  ;;  %v1526_v40 = vadd.f32 %v1491_v46, %v1463_v35  ;;  %v910_v30 = vpop.f32.mrb[15].mxu1 }
 0x1bf   : > { %v1127_v34 = vmax.f32 %v1111_v47, 0.0  ;;  %v1527_v48 = vadd.f32 %v1067_v37, %v910_v30 }
 0x1c0   : > { %1144 = vst [vmem:[%s2203_s29 + $0x68] sm:$0xff] %v1128_v39  ;;  %v1114_v42 = vadd.f32 %v1526_v40, %v2197_v33 }
 0x1c1   : > { %1143 = vst [vmem:[%s2203_s29 + $0x60] sm:$0xff] %v1127_v34  ;;  %v1113_v43 = vadd.f32 %v1527_v48, %v2197_v33 }
 0x1c2   : > { %v1130_v49 = vmax.f32 %v1114_v42, 0.0 }
 0x1c3   : > { %v1129_v50 = vmax.f32 %v1113_v43, 0.0 }
 0x1c4   : > { %1146 = vst [vmem:[%s2203_s29 + $0x78] sm:$0xff] %v1130_v49 }
 0x1c5   : > { %1145 = vst [vmem:[%s2203_s29 + $0x70] sm:$0xff] %v1129_v50 }
 0x1c6   : > { %1634 = shalt.err (!%p1631_p7)
}
 0x1c7   : > { %s1635_s21 = scalar_lea.hbm %s2239_s10, 2048  ;;  %s1639_s5 = scalar_lea.hbm %s2303_s3, 8192 }
 0x1c8   : > { %p1636_p9 = scmp.ne.s32.totalorder %s2239_s10, %s1635_s21  ;;  %p1640_p12 = scmp.lt.u32.totalorder %s2239_s10, %s2303_s3 }
 0x1c9   : > { %p1641_p13 = scmp.lt.u32.totalorder %s1639_s5, %s1635_s21  ;;  %p1643_p1 = scmp.lt.u32.totalorder %s1635_s21, %s2239_s10 }
 0x1ca   : > { %p1637_p10 = pnand %p1636_p9, %p1793_p3 }
 0x1cb   : > { %p1642_p0 = por %p1641_p13, %p1640_p12 }
 0x1cc   : > { %p1638_p11 = pneg %p1637_p10 }
 0x1cd   : > { %p1644_p2 = por %p1643_p1, %p1642_p0 }
 0x1cf   : > { %p1645_p4 = pnand %p1644_p2, %p1638_p11 }
 0x1d1   : > { %1648 = shalt.err (!%p1645_p4)
}
 0x1d2   : > { %s1721_s6 = smov 128  }
 0x1d3   : > { %1546 = dma.vmem_to_hbm [thread:$0]  (%p1793_p3), %s2241_s16, 2048, %s2239_s10, %s2247_s11, %s1721_s6, %s1721_s6, %s1719_s8  }
 0x1d4 PF: > { %p1552_p5 = scmp.ge.s32.totalorder %s1715_s19, 2  ;;  %s1180_s9 = sand.u32 1, %s1687_s12  }
 0x1d5   : > { %s1181_s20 = scalar_lea.sflag [#allocation3], %s1180_s9 }
 0x1d6   : > { %p1549_p6 = pnand %p1552_p5, %p1802_p8 }
 0x1d8   : > { %1682 = dma.done.wait (!%p1549_p6), %s1181_s20, 2048  }
 0x1d9   : > { %1684 = vsyncadd (!%p1549_p6), %s1181_s20, 4294965248  ;;  %s16_s19 = sadd.s32 1, %s1715_s19   ;;  %s2308_s12 = smov %s1691_s13 }
 0x1da   : > { %p13_p7 = scmp.ge.s32.totalorder %s16_s19, 6   ;;  %s2309_s13 = smov %s1695_s14 }
 0x1db   : > { %s2310_s14 = smov %s1811_s30  ;;  %s2311_s15 = smov %s1707_s17 }
 0x1dc   : > { %s2312_s16 = smov %s1711_s18  ;;  %s2313_s17 = smov %s2316_s22 }
 0x1dd   : > { %s2314_s18 = smov %s2320_s23  ;;  %15 = sbr.rel (!%p13_p7) target bundleno = 5 (0x5), region = 75 }
 0x1e4   :  { %1186 = vsyncpa [#allocation3], 1 }
 0x1e5   :  { %1188 = vsyncpa [#allocation3 + $0x1], 1 }

</bundles_post_ra>
